<compile_context>
chip_gen: v6e
topology: v6e:2x2x1
jax: 0.10.0
libtpu: 0.0.40
codegen_flags: <defaults>
</compile_context>

<pallas_src>
import jax
import jax.numpy as jnp
from jax import lax
from jax.experimental import pallas as pl
from jax.experimental.pallas import tpu as pltpu


# ----------------------------- small host-side helpers -----------------------------

def _cdiv(a, b):
    return -(-a // b)


def _round_up(x, m):
    return _cdiv(x, m) * m


def _vmem_limit(footprint_bytes):
    # Derived from the real buffer footprint (+50% and 2 MiB slack for compiler
    # scratch), floored so tiny test shapes still compile, capped < v7x 64 MiB.
    return int(min(48 * 2**20, max(16 * 2**20, 1.5 * footprint_bytes + 2 * 2**20)))


def _pick_h_tile(H, W, itemsize, sublane, cap_bytes):
    """Largest H tile (multiple of `sublane`, divisor of H) with tile <= cap.
    Falls back to the full plane if nothing fits / plane already small."""
    if H * W * itemsize <= cap_bytes or H <= sublane:
        return H
    best = None
    t = sublane
    while t < H:
        if H % t == 0 and t * W * itemsize <= cap_bytes:
            best = t
        t += sublane
    return best if best is not None else H


# ----------------------------------- kernel body -----------------------------------

def _bce_elem(x, y):
    """Numerically-stable BCE-with-logits (matches nn.BCEWithLogitsLoss)."""
    x = x.astype(jnp.float32)
    y = y.astype(jnp.float32)
    return jnp.maximum(x, 0.0) - x * y + jnp.log1p(jnp.exp(-jnp.abs(x)))


def _bce_block_kernel(*refs):
    """Shared body for both paths.

    refs = (*unused_prefetch_refs, pred_ref, tgt_ref, out_ref)
      pred_ref/tgt_ref : (R, C) block of logits / binary targets (any float dtype)
      out_ref          : (8, 128) f32; its element-sum equals the sum of
                         elementwise BCE losses over this block.
    """
    pred_ref, tgt_ref, out_ref = refs[-3], refs[-2], refs[-1]
    R, C = pred_ref.shape

    if R % 8 == 0 and C % 128 == 0:
        groups, chunks = R // 8, C // 128

        def group_partial(x, y):
            # Fused load+BCE for one 8-row group, folded to (8,128) with
            # lane-aligned static slices: pure VPU adds, no XLU per group.
            l = _bce_elem(x, y)                       # (8, C) f32
            f = l[:, 0:128]
            for c in range(1, chunks):
                f = f + l[:, c * 128:(c + 1) * 128]
            return f                                   # (8, 128)

        if groups <= 32:
            acc = None
            for g in range(groups):
                f = group_partial(pred_ref[g * 8:(g + 1) * 8, :],
                                  tgt_ref[g * 8:(g + 1) * 8, :])
                acc = f if acc is None else acc + f
        else:
            # Long blocks: keep code size bounded; carry is a single vreg.
            def body(g, acc):
                r0 = pl.multiple_of(g * 8, 8)
                return acc + group_partial(pred_ref[pl.ds(r0, 8), :],
                                           tgt_ref[pl.ds(r0, 8), :])
            acc = lax.fori_loop(0, groups, body, jnp.zeros((8, 128), jnp.float32))
        out_ref[...] = acc
    else:
        # Ragged (non-8/128-aligned) fallback: one cross-lane reduce per block
        # (negligible next to the block DMA); scalar placed at [0, 0] so the
        # wrapper-side sum stays exact.
        total = jnp.sum(_bce_elem(pred_ref[...], tgt_ref[...]))
        rows = lax.broadcasted_iota(jnp.int32, (8, 128), 0)
        cols = lax.broadcasted_iota(jnp.int32, (8, 128), 1)
        out_ref[...] = jnp.where((rows == 0) & (cols == 0), total, 0.0)


# ------------------------------ path A: pre-gathered ------------------------------

def _run_pregathered(predict, target, pidx, tidx, HW, block_bytes, cast_targets_bf16):
    """Small planes: host-side gather into a lane-dense slab, many pairs/block."""
    B, Cp, _, _ = predict.shape
    _, Ct, _, _ = target.shape
    N = int(pidx.shape[0])
    P = _round_up(HW, 128)

    pred_sel = predict.reshape(B * Cp, HW)[pidx]
    tgt_sel = target.reshape(B * Ct, HW)[tidx]
    if cast_targets_bf16 and tgt_sel.dtype == jnp.float32:
        # Targets are binary {0,1} masks -> bf16 is exact and halves this stream.
        tgt_sel = tgt_sel.astype(jnp.bfloat16)

    pred_item = jnp.dtype(pred_sel.dtype).itemsize
    tgt_item = jnp.dtype(tgt_sel.dtype).itemsize

    # K pairs per block, targeting ~block_bytes for the wider (predict) stream,
    # but balanced across blocks so row padding stays < 8 rows.
    rows_cap = max(8, (block_bytes // max(1, P * pred_item)) // 8 * 8)
    n_blocks = max(1, _cdiv(N, rows_cap))
    K = min(rows_cap, _round_up(_cdiv(N, n_blocks), 8))
    n_blocks = _cdiv(N, K)
    N_pad = n_blocks * K

    # Padding that contributes exactly zero loss: logit=-1e4, target=0
    #   max(-1e4,0)=0, -x*y=0, log1p(exp(-1e4))=0.
    PAD_LOGIT = -1.0e4
    pred_sel = jnp.pad(pred_sel, ((0, N_pad - N), (0, P - HW)),
                       constant_values=PAD_LOGIT)
    tgt_sel = jnp.pad(tgt_sel, ((0, N_pad - N), (0, P - HW)))

    footprint = (2 * K * P * (pred_item + tgt_item)      # double-buffered inputs
                 + 2 * 8 * 128 * 4                       # double-buffered output
                 + 4 * 8 * P * 4)                        # per-group f32 temporaries
    return pl.pallas_call(
        _bce_block_kernel,
        out_shape=jax.ShapeDtypeStruct((n_blocks * 8, 128), jnp.float32),
        grid_spec=pltpu.PrefetchScalarGridSpec(
            num_scalar_prefetch=0,
            grid=(n_blocks,),
            in_specs=[pl.BlockSpec((K, P), lambda i: (i, 0)),
                      pl.BlockSpec((K, P), lambda i: (i, 0))],
            out_specs=pl.BlockSpec((8, 128), lambda i: (i, 0)),
        ),
        compiler_params=pltpu.CompilerParams(
            dimension_semantics=("parallel",),
            vmem_limit_bytes=_vmem_limit(footprint),
        ),
    )(pred_sel, tgt_sel)


# --------------------------- path B: in-kernel gather ------------------------------

def _run_gather(predict, target, pidx, tidx, block_bytes):
    """Large planes: scalar-prefetched plane indices, gather via index_map,
    no host-side gather/pad HBM round trip."""
    B, Cp, H, W = predict.shape
    _, Ct, _, _ = target.shape
    N = int(pidx.shape[0])

    pred3 = predict.reshape(B * Cp, H, W)   # free reshape (contiguous layout)
    tgt3 = target.reshape(B * Ct, H, W)

    pred_item = jnp.dtype(predict.dtype).itemsize
    tgt_item = jnp.dtype(target.dtype).itemsize
    sublane = max(32 // pred_item, 32 // tgt_item)     # f32->8, bf16->16, int8->32
    h_tile = _pick_h_tile(H, W, max(pred_item, tgt_item), sublane, block_bytes)
    s_tiles = H // h_tile if (H % h_tile == 0) else 1
    if s_tiles == 1:
        h_tile = H
    # TODO(synk): if a single row of a plane (W) alone exceeds VMEM budgets, a
    # lane-axis grid split with in-kernel masking would be needed as well.

    aligned = (h_tile % 8 == 0) and (W % 128 == 0)
    footprint = (2 * h_tile * W * (pred_item + tgt_item)
                 + 2 * 8 * 128 * 4
                 + (3 * 8 * W * 4 if aligned else 3 * h_tile * W * 4))

    return pl.pallas_call(
        _bce_block_kernel,
        out_shape=jax.ShapeDtypeStruct((N * s_tiles * 8, 128), jnp.float32),
        grid_spec=pltpu.PrefetchScalarGridSpec(
            num_scalar_prefetch=2,                      # pidx, tidx -> SMEM
            grid=(N, s_tiles),
            in_specs=[
                pl.BlockSpec((None, h_tile, W),
                             lambda i, s, pidx_ref, tidx_ref: (pidx_ref[i], s, 0)),
                pl.BlockSpec((None, h_tile, W),
                             lambda i, s, pidx_ref, tidx_ref: (tidx_ref[i], s, 0)),
            ],
            out_specs=pl.BlockSpec(
                (8, 128),
                lambda i, s, pidx_ref, tidx_ref, st=s_tiles: (i * st + s, 0)),
        ),
        compiler_params=pltpu.CompilerParams(
            dimension_semantics=("parallel", "parallel"),
            vmem_limit_bytes=_vmem_limit(footprint),
        ),
    )(pidx, tidx, pred3, tgt3)


# ----------------------------------- public wrapper --------------------------------

def multi_bce_loss_pallas(predict, target, pair_b, pair_organ, *,
                          small_plane_bytes=256 * 1024,
                          block_bytes=2 * 1024 * 1024,
                          cast_targets_bf16=True):
    """predict: (B, C_pred, H, W), target: (B, C_tgt, H, W) (NCHW, like PyTorch).

    pair_b / pair_organ: int32 arrays of shape (N,) with the (batch, organ)
    pairs selected by the name/TEMPLATE logic (host-side glue).
    Inputs may be f32 or bf16; math is done in f32 inside the kernel.
    """
    assert predict.shape[2:] == target.shape[2:], "predict & target shape do not match"
    B, Cp, H, W = predict.shape
    _, Ct, _, _ = target.shape
    HW = H * W
    N = int(pair_b.shape[0])
    if N == 0:
        # PyTorch would raise on an empty stack; guard the division instead.
        return jnp.float32(0.0)

    pair_b = pair_b.astype(jnp.int32)
    pair_organ = pair_organ.astype(jnp.int32)
    pidx = pair_b * Cp + (pair_organ - 1)          # rows into (B*Cp, ...)
    tidx = pair_b * Ct + (36 + pair_organ - 1)     # rows into (B*Ct, ...)

    plane_bytes = HW * max(jnp.dtype(predict.dtype).itemsize,
                           jnp.dtype(target.dtype).itemsize)
    if plane_bytes < small_plane_bytes:
        out = _run_pregathered(predict, target, pidx, tidx, HW,
                               block_bytes, cast_targets_bf16)
    else:
        out = _run_gather(predict, target, pidx, tidx, block_bytes)

    # stack(per-pair means).sum() / N  ==  sum(all element losses) / (H*W * N)
    return jnp.sum(out) * (1.0 / (float(HW) * float(N)))


# ------------------------- Python glue: name / TEMPLATE parsing --------------------
# TODO(synk): the string parsing / dict lookup has no Pallas equivalent; it stays host-side.

def _template_key(name):
    dataset_index = int(name[0:2])
    if dataset_index == 10:
        return name[0:2] + "_" + name[17:19]
    elif dataset_index == 1:
        return "01_2" if int(name[-2:]) >= 60 else "01"
    else:
        return name[0:2]


def build_pairs(name, TEMPLATE):
    pair_b, pair_organ = [], []
    for b in range(len(name)):
        key = _template_key(name[b])
        for organ in TEMPLATE[key]:
            pair_b.append(b)
            pair_organ.append(organ)
    return jnp.asarray(pair_b, jnp.int32), jnp.asarray(pair_organ, jnp.int32)


# ------------------------------------- reference -----------------------------------

def _reference(predict, target, pair_b, pair_organ):
    def one(b, organ):
        x = predict[b, organ - 1].astype(jnp.float32)
        y = target[b, 36 + organ - 1].astype(jnp.float32)
        per_elem = jnp.maximum(x, 0.0) - x * y + jnp.log1p(jnp.exp(-jnp.abs(x)))
        return jnp.mean(per_elem)
    losses = jax.vmap(one)(pair_b, pair_organ)
    return jnp.sum(losses) / losses.shape[0]


# --------------------------------------- test ---------------------------------------

if __name__ == "__main__":
    root = jax.random.PRNGKey(0)
    keys = jax.random.split(root, 8)

    def make_inputs(key, B, Cp, H, W):
        Ct = 36 + Cp
        k1, k2 = jax.random.split(key)
        predict = jax.random.normal(k1, (B, Cp, H, W), jnp.float32)
        target = jax.random.bernoulli(k2, 0.3, (B, Ct, H, W)).astype(jnp.float32)
        return predict, target

    # Deterministic synthetic names + TEMPLATE (replicates the module's lookup logic).
    name2 = ["03_case0001", "05_case0002"]
    tmpl2 = {"03": [1, 2], "05": [1, 3, 4]}
    pb2, po2 = build_pairs(name2, tmpl2)

    cases = []

    # 1) default pre-gather path, small 16x16 planes.
    p1, t1 = make_inputs(keys[0], 2, 4, 16, 16)
    cases.append(("pregather-16x16", p1, t1, pb2, po2, {}))
    # 2) forced in-kernel-gather path on the same ragged planes (scalar fallback).
    cases.append(("gather-16x16", p1, t1, pb2, po2, {"small_plane_bytes": 0}))
    # 3) forced gather path on lane-aligned 16x128 planes (VPU fold path).
    p3, t3 = make_inputs(keys[1], 2, 4, 16, 128)
    cases.append(("gather-16x128", p3, t3, pb2, po2, {"small_plane_bytes": 0}))
    # 4) many pairs (8 names x 40 organs = 320) -> large K -> fori group loop.
    B4, Cp4 = 8, 40
    p4, t4 = make_inputs(keys[2], B4, Cp4, 16, 16)
    name4 = ["%02d_case%04d" % (20 + b, b) for b in range(B4)]
    tmpl4 = {"%02d" % (20 + b): list(range(1, Cp4 + 1)) for b in range(B4)}
    pb4, po4 = build_pairs(name4, tmpl4)
    cases.append(("pregather-many-pairs", p4, t4, pb4, po4, {}))
    # 5) ragged 12x20 planes through the gather path.
    p5, t5 = make_inputs(keys[3], 2, 4, 12, 20)
    cases.append(("gather-12x20", p5, t5, pb2, po2, {"small_plane_bytes": 0}))

    for tag, predict, target, pb, po, kw in cases:
        out = multi_bce_loss_pallas(predict, target, pb, po, **kw)
        out = jax.block_until_ready(out)
        ref = _reference(predict, target, pb, po)
        assert jnp.allclose(out, ref, rtol=1e-4, atol=1e-5), (tag, out, ref)

    print("KERNEL_OK")
</pallas_src>

<mosaic_0001>
module attributes {stable_mosaic.version = 11 : i64} {
  func.func @_bce_block_kernel(%arg0: i32, %arg1: memref<8x256xf32, #tpu.memory_space<vmem>>, %arg2: memref<8x256xbf16, #tpu.memory_space<vmem>>, %arg3: memref<8x128xf32, #tpu.memory_space<vmem>>) attributes {dimension_semantics = [#tpu.dimension_semantics<parallel>], iteration_bounds = array<i64: 1>, scalar_prefetch = 0 : i64, scratch_operands = 0 : i64, tpu.core_type = #tpu.core_type<tc>, window_params = [{transform_indices = @transform_0, window_bounds = array<i64: 8, 256>}, {transform_indices = @transform_1, window_bounds = array<i64: 8, 256>}, {transform_indices = @transform_2, window_bounds = array<i64: 8, 128>}]} {
    %c0 = arith.constant 0 : index
    %c0_0 = arith.constant 0 : index
    %0 = vector.load %arg1[%c0, %c0_0] : memref<8x256xf32, #tpu.memory_space<vmem>>, vector<8x256xf32>
    %c0_1 = arith.constant 0 : index
    %c0_2 = arith.constant 0 : index
    %1 = vector.load %arg2[%c0_1, %c0_2] : memref<8x256xbf16, #tpu.memory_space<vmem>>, vector<8x256xbf16>
    %2 = arith.extf %1 : vector<8x256xbf16> to vector<8x256xf32>
    %cst = arith.constant 0.000000e+00 : f32
    %3 = vector.broadcast %cst : f32 to vector<8x256xf32>
    %4 = arith.maximumf %0, %3 : vector<8x256xf32>
    %5 = arith.mulf %0, %2 : vector<8x256xf32>
    %6 = arith.subf %4, %5 : vector<8x256xf32>
    %7 = math.absf %0 : vector<8x256xf32>
    %cst_3 = arith.constant 0.000000e+00 : f32
    %8 = vector.broadcast %cst_3 : f32 to vector<8x256xf32>
    %9 = arith.subf %8, %7 : vector<8x256xf32>
    %10 = math.exp %9 : vector<8x256xf32>
    %11 = math.log1p %10 : vector<8x256xf32>
    %12 = arith.addf %6, %11 : vector<8x256xf32>
    %13 = vector.extract_strided_slice %12 {offsets = [0, 0], sizes = [8, 128], strides = [1, 1]} : vector<8x256xf32> to vector<8x128xf32>
    %14 = vector.extract_strided_slice %12 {offsets = [0, 128], sizes = [8, 128], strides = [1, 1]} : vector<8x256xf32> to vector<8x128xf32>
    %15 = arith.addf %13, %14 : vector<8x128xf32>
    %c0_4 = arith.constant 0 : index
    %c0_5 = arith.constant 0 : index
    %16 = vector.load %arg3[%c0_4, %c0_5] : memref<8x128xf32, #tpu.memory_space<vmem>>, vector<8x128xf32>
    tpu.vector_store %arg3[%c0_4, %c0_5], %15 {strides = array<i32>} : memref<8x128xf32, #tpu.memory_space<vmem>>, vector<8x128xf32>,
    return
  }
  func.func @transform_0(%arg0: i32) -> (i32, i32) {
    %c0_i32 = arith.constant 0 : i32
    %c0_i32_0 = arith.constant 0 : i32
    return %arg0, %c0_i32 : i32, i32
  }
  func.func @transform_1(%arg0: i32) -> (i32, i32) {
    %c0_i32 = arith.constant 0 : i32
    %c0_i32_0 = arith.constant 0 : i32
    return %arg0, %c0_i32 : i32, i32
  }
  func.func @transform_2(%arg0: i32) -> (i32, i32) {
    %c0_i32 = arith.constant 0 : i32
    %c0_i32_0 = arith.constant 0 : i32
    return %arg0, %c0_i32 : i32, i32
  }
}

</mosaic_0001>

<bundles_post_ra>
// kernel: tpu_custom_call.1
= control target key start
LH: loop header
LB: loop body
LE: loop exit
PB: predicated region body
PF: predicated region fallthrough
CT: control target
= control target key end

     0   :  { %7 = vsyncpa [#allocation3], 0  ;;  %s197_s0 = inlined_call_operand.hbm [shape: f32[8,256], index: 0, kind: input, shape index: {}]   ;;  %s198_s1 = inlined_call_operand.hbm [shape: bf16[8,256], index: 1, kind: input, shape index: {}]   ;;  %s199_s2 = inlined_call_operand.hbm [shape: f32[8,128], index: 2, kind: output, shape index: {}]  }
   0x1   :  { %8 = vsyncpa [#allocation6], 0 }
   0x2   :  { %9 = vsyncpa [#allocation4], 0  ;;  %s170_s9 = smov [#allocation2]   ;;  %s171_s11 = smov [#allocation5]  }
   0x3   :  { %s16_s10 = sshll.u32 %s170_s9, 4  ;;  %s26_s12 = sshll.u32 %s171_s11, 4  ;;  %s17_s10 = int_to_ptr.vmem [resolvable:$true] %s16_s10  ;;  %s27_s12 = int_to_ptr.vmem [resolvable:$true] %s26_s12 }
   0x4   :  { %s112_s13 = scalar_lea.vmem %s17_s10, 256  ;;  %p117_p1 = scmp.lt.s32.totalorder %s17_s10, %s17_s10 }
   0x5   :  { %p113_p0 = scmp.ne.s32.totalorder %s17_s10, %s112_s13  ;;  %p118_p2 = scmp.lt.s32.totalorder %s112_s13, %s112_s13 }
   0x7   :  { %p119_p3 = por %p118_p2, %p117_p1 }
   0x9   :  { %p120_p4 = pnand %p119_p3, %p113_p0 }
   0xb   :  { %123 = shalt.err (!%p120_p4)
}
   0xc   :  { %19 = dma.hbm_to_vmem [thread:$0]  %s197_s0, 256, %s17_s10, [#allocation3]  }
   0xd   :  { %s132_s16 = scalar_lea.vmem %s27_s12, 128  ;;  %p137_p6 = scmp.lt.s32.totalorder %s27_s12, %s27_s12 }
   0xe   :  { %p133_p5 = scmp.ne.s32.totalorder %s27_s12, %s132_s16  ;;  %p138_p7 = scmp.lt.s32.totalorder %s132_s16, %s132_s16 }
  0x10   :  { %p139_p8 = por %p138_p7, %p137_p6 }
  0x12   :  { %p140_p9 = pnand %p139_p8, %p133_p5 }
  0x14   :  { %143 = shalt.err (!%p140_p9)
}
  0x15   :  { %29 = dma.hbm_to_vmem [thread:$0]  %s198_s1, 128, %s27_s12, [#allocation6]  }
  0x16   :  { %164 = dma.done.wait [#allocation3], 256  }
  0x17   :  { %165 = vsyncadd [#allocation3], 4294967040 }
  0x18   :  { %166 = dma.done.wait [#allocation6], 128  }
  0x19   :  { %167 = vsyncadd [#allocation6], 4294967168  ;;  %v36_v0 = vld [vmem:[#allocation2] sm:$0xff]  ;;  %v37_v1 = vld [vmem:[#allocation2 + $0x8] sm:$0xff]  ;;  %s172_s0 = smov [#allocation7]  }
  0x1a   :  { %v47_v2 = vand.u32 2147483647, %v36_v0  ;;  %v48_v3 = vand.u32 2147483647, %v37_v1  ;;  %v38_v12 = vld [vmem:[#allocation5] sm:$0xff]  ;;  %v41_v18 = vmax.f32 %v36_v0, 0.0 }
  0x1b   :  { %v39_v14 = vunpack.c.l.bf16 %v38_v12  ;;  %v40_v16 = vunpack.c.h.bf16 %v38_v12  ;;  %v42_v22 = vmax.f32 %v37_v1, 0.0  ;;  %s83_s1 = sshll.u32 %s172_s0, 4  ;;  %s84_s1 = int_to_ptr.vmem [resolvable:$true] %s83_s1 }
  0x1c   :  { %v49_v4 = vsub.f32 0.0, %v47_v2  ;;  %v50_v5 = vsub.f32 0.0, %v48_v3  ;;  %s144_s19 = scalar_lea.vmem %s84_s1, 128  ;;  %p149_p11 = scmp.lt.s32.totalorder %s84_s1, %s84_s1 }
  0x1d   :  { %v43_v19 = vmul.f32 %v39_v14, %v36_v0  ;;  %v44_v23 = vmul.f32 %v40_v16, %v37_v1  ;;  %p145_p10 = scmp.ne.s32.totalorder %s84_s1, %s144_s19  ;;  %p150_p12 = scmp.lt.s32.totalorder %s144_s19, %s144_s19 }
  0x1e   :  { %v51_v6 = vmul.f32 1.442695, %v49_v4  ;;  %v53_v7 = vmul.f32 1.442695, %v50_v5 }
  0x1f   :  { %v45_v27 = vsub.f32 %v41_v18, %v43_v19  ;;  %v46_v30 = vsub.f32 %v42_v22, %v44_v23  ;;  %p151_p13 = por %p150_p12, %p149_p11 }
  0x20   :  { %96 = vpow2.f32 %v51_v6 }
  0x21   :  { %98 = vpow2.f32 %v53_v7  ;;  %p152_p0 = pnand %p151_p13, %p145_p10 }
  0x2d   :  { %v97_v8 = vpop.eup %96 }
  0x2e   :  { %v99_v9 = vpop.eup %98  ;;  %v55_v10 = vadd.f32 1.0, %v97_v8  ;;  %v58_v13 = vmul.f32 -0.5, %v97_v8  ;;  %v61_v20 = vand.u32 2147483647, %v97_v8 }
  0x2f   :  { %v64_v11 = vadd.f32 1.0, %v99_v9  ;;  %v67_v15 = vmul.f32 -0.5, %v99_v9  ;;  %v70_v24 = vand.u32 2147483647, %v99_v9 }
  0x30   :  { %100 = vlog2.f32 %v55_v10  ;;  %v59_v17 = vadd.f32 1.0, %v58_v13  ;;  %vm62_vm0 = vcmp.lt.f32.partialorder %v61_v20, 0.0004427343 }
  0x31   :  { %102 = vlog2.f32 %v64_v11  ;;  %v68_v21 = vadd.f32 1.0, %v67_v15  ;;  %vm71_vm1 = vcmp.lt.f32.partialorder %v70_v24, 0.0004427343 }
  0x32   :  { %v60_v25 = vmul.f32 %v97_v8, %v59_v17 }
  0x33   :  { %v69_v28 = vmul.f32 %v99_v9, %v68_v21 }
  0x3d   :  { %v101_v26 = vpop.eup %100 }
  0x3e   :  { %v103_v29 = vpop.eup %102  ;;  %v57_v31 = vmul.f32 0.6931472, %v101_v26 }
  0x3f   :  { %v66_v32 = vmul.f32 0.6931472, %v103_v29 }
  0x40   :  { %v63_v33 = vsel %vm62_vm0, %v60_v25, %v57_v31 }
  0x41   :  { %v72_v34 = vsel %vm71_vm1, %v69_v28, %v66_v32  ;;  %v73_v35 = vadd.f32 %v63_v33, %v45_v27 }
  0x42   :  { %v74_v36 = vadd.f32 %v72_v34, %v46_v30 }
  0x44   :  { %v75_v37 = vadd.f32 %v74_v36, %v73_v35 }
  0x46   :  { %76 = vst [vmem:[#allocation7] sm:$0xff] %v75_v37 }
  0x47   :  { %155 = shalt.err (!%p152_p0)
}
  0x48   :  { %86 = dma.vmem_to_hbm [thread:$0]  %s84_s1, 128, %s199_s2, [#allocation4]  }
  0x49   :  { %168 = dma.done.wait [#allocation4], 128  }
  0x4a   :  { %169 = vsyncadd [#allocation4], 4294967168 }
  0x4b   :  { %90 = vsyncpa [#allocation3], 1 }
  0x4c   :  { %91 = vsyncpa [#allocation6], 1 }
  0x4d   :  { %92 = vsyncpa [#allocation4], 1 }

</bundles_post_ra>
